<compile_context>
chip_gen: v7x
topology: tpu7x:2x2x1
jax: 0.10.0
libtpu: 0.0.40
codegen_flags: <defaults>
</compile_context>

<pallas_src>
import functools

import jax
import jax.numpy as jnp
from jax.experimental import pallas as pl
from jax.experimental.pallas import tpu as pltpu

LANES = 128
CHUNK_ROWS = 512        # in-kernel compute chunk: (512,128) f32 temporaries = 256 KiB
MAX_BLOCK_ROWS = 8192   # DMA block: (8192,128) f32 = 4 MiB per input per pipeline buffer
MIN_SPLIT_ROWS = 512    # only split across TensorCores when each half has >= this many rows
PAD_LOGIT = -1e4        # sentinel logit: with target 0 the focal term is exactly 0


def _round_up(x, m):
    return (x + m - 1) // m * m


def _focal_loss_kernel(x_ref, t_ref, out_ref, acc_ref, *,
                       alpha, gamma, binary_targets,
                       block_rows, inner, total_rows, needs_mask):
    c = pl.program_id(0)
    i = pl.program_id(1)

    @pl.when(i == 0)
    def _():
        acc_ref[...] = jnp.zeros_like(acc_ref)

    # Unclamped global row offset of this block (used only for masking; blocks whose
    # rows lie entirely past `total_rows` contribute exactly 0).
    row0 = (c * inner + i) * block_rows

    def accumulate(xs, ts, base_row):
        x = xs if xs.dtype == jnp.float32 else xs.astype(jnp.float32)
        t = ts if ts.dtype == jnp.float32 else ts.astype(jnp.float32)

        e = jnp.exp(-jnp.abs(x))                     # EUP
        z = jnp.maximum(x, 0.0) - x * t
        bce = z + jnp.log1p(e)                       # EUP; == BCEWithLogitsLoss(red='none')
        if binary_targets:
            # Exact for t in {0,1}: z is either 0 or |x|, so exp(-z) is a select and
            # exp(-bce) = exp(-z) / (1 + e).  Saves one EUP exp per element.
            pt = jnp.where(z > 0.0, e, 1.0) / (1.0 + e)
        else:
            pt = jnp.exp(-bce)                       # EUP
        d = 1.0 - pt
        if gamma == 2.0:
            w = d * d                                # VPU multiply; no pow lowering
        elif gamma == 1.0:
            w = d
        elif gamma == 0.0:
            w = None                                 # (1-pt)**0 == 1
        else:
            w = jnp.maximum(d, 0.0) ** gamma         # clamp guards pow against pt>1 by an ulp
        f = bce if w is None else w * bce
        if alpha != 1.0:
            f = alpha * f

        if needs_mask:
            rr = jax.lax.broadcasted_iota(jnp.int32, f.shape, 0) + base_row
            f = jnp.where(rr < total_rows, f, 0.0)

        # Full-vreg accumulation: no per-chunk cross-lane/sublane (XLU) reduce.
        acc_ref[...] += f.reshape(-1, 8, LANES).sum(axis=0)

    n_full = block_rows // CHUNK_ROWS
    tail = block_rows % CHUNK_ROWS

    if n_full > 0:
        @pl.loop(0, n_full)
        def _(j):
            r = pl.multiple_of(j * CHUNK_ROWS, CHUNK_ROWS)
            accumulate(x_ref[pl.ds(r, CHUNK_ROWS), :],
                       t_ref[pl.ds(r, CHUNK_ROWS), :],
                       row0 + r)
    if tail > 0:
        r = n_full * CHUNK_ROWS
        accumulate(x_ref[pl.ds(r, tail), :], t_ref[pl.ds(r, tail), :], row0 + r)

    @pl.when(i == pl.num_programs(1) - 1)
    def _():
        out_ref[0, 0] = jnp.sum(acc_ref[...])   # single cross-sublane+lane reduce per split


def focal_loss(inputs, targets, alpha=1.0, gamma=2.0, *, binary_targets=False):
    """Scalar focal loss matching the PyTorch FocalLoss.forward.

    Streams the inputs in their native dtypes (pass bf16 logits / int8 targets for a
    bandwidth win). Set binary_targets=True only if every target is exactly 0 or 1.
    """
    assert inputs.shape == targets.shape
    n = inputs.size

    x = inputs.reshape(-1)
    t = targets.reshape(-1)

    # Pad only to an (8,128)-aligned element count (<= 1023 sentinel elements). The
    # sentinel (x=-1e4, t=0) contributes exactly 0, so no mask stream is needed and
    # no host-side padding up to a full DMA-block multiple (block/split raggedness
    # is masked inside the kernel instead of re-materializing both streams).
    aligned = _round_up(n, 8 * LANES)
    if aligned != n:
        x = jnp.pad(x, (0, aligned - n), constant_values=PAD_LOGIT)
        t = jnp.pad(t, (0, aligned - n), constant_values=0)
    rows = aligned // LANES

    x2 = x.reshape(rows, LANES)   # free reshape when n was already aligned
    t2 = t.reshape(rows, LANES)

    # DMA block sizing: big blocks amortize the ~0.35us/step grid overhead; the
    # in-kernel CHUNK_ROWS loop keeps elementwise temporaries vreg-sized.
    if rows > MAX_BLOCK_ROWS:
        block_rows = MAX_BLOCK_ROWS
    elif rows >= 2 * MIN_SPLIT_ROWS:
        block_rows = _round_up(pl.cdiv(rows, 2), 8)   # guarantee >=2 blocks for the TC split
    else:
        block_rows = rows
    num_blocks = pl.cdiv(rows, block_rows)

    # 2-way split across TensorCores (v7x megacore); harmless no-op on 1-TC chips.
    num_splits = 2 if num_blocks >= 2 else 1
    inner = pl.cdiv(num_blocks, num_splits)

    # The (num_splits, inner) grid may over-cover the array (ragged last block and/or
    # odd block count); over-covered rows are zero-masked inside the kernel.
    needs_mask = (num_splits * inner * block_rows != rows)

    if num_splits * inner == num_blocks:
        in_spec = pl.BlockSpec((block_rows, LANES), lambda c, i: (c * inner + i, 0))
    else:
        last = num_blocks - 1
        in_spec = pl.BlockSpec((block_rows, LANES),
                               lambda c, i: (jnp.minimum(c * inner + i, last), 0))

    kernel = functools.partial(
        _focal_loss_kernel,
        alpha=float(alpha), gamma=float(gamma), binary_targets=bool(binary_targets),
        block_rows=block_rows, inner=inner, total_rows=rows, needs_mask=needs_mask)

    itemsize = x2.dtype.itemsize + t2.dtype.itemsize
    vmem_limit = min(48 * 1024 * 1024,
                     2 * block_rows * LANES * itemsize + 24 * 1024 * 1024)

    partials = pl.pallas_call(
        kernel,
        out_shape=jax.ShapeDtypeStruct((num_splits, 1), jnp.float32),
        grid_spec=pltpu.PrefetchScalarGridSpec(
            num_scalar_prefetch=0,
            grid=(num_splits, inner),
            in_specs=[in_spec, in_spec],
            out_specs=pl.BlockSpec((1, 1), lambda c, i: (c, 0),
                                   memory_space=pltpu.SMEM),
            scratch_shapes=[pltpu.VMEM((8, LANES), jnp.float32)],
        ),
        compiler_params=pltpu.CompilerParams(
            dimension_semantics=("parallel", "arbitrary"),
            vmem_limit_bytes=vmem_limit),
    )(x2, t2)

    return jnp.sum(partials) / jnp.float32(n)


def focal_loss_ref(inputs, targets, alpha=1.0, gamma=2.0):
    x = inputs.astype(jnp.float32)
    t = targets.astype(jnp.float32)
    bce = jnp.maximum(x, 0.0) - x * t + jnp.log1p(jnp.exp(-jnp.abs(x)))
    pt = jnp.exp(-bce)
    return jnp.mean(alpha * (1.0 - pt) ** gamma * bce)


if __name__ == "__main__":
    key = jax.random.PRNGKey(0)
    k1, k2, k3, k4, k5, k6 = jax.random.split(key, 6)

    # Small NCHW shape consistent with the module: logits + binary targets.
    shape = (2, 4, 16, 16)
    x1 = jax.random.normal(k1, shape, dtype=jnp.float32) * 2.0
    t1 = (jax.random.uniform(k2, shape) > 0.5).astype(jnp.float32)
    out1 = jax.block_until_ready(focal_loss(x1, t1, alpha=1.0, gamma=2.0))
    ref1 = focal_loss_ref(x1, t1, 1.0, 2.0)
    assert jnp.allclose(out1, ref1, rtol=1e-5, atol=1e-6), (out1, ref1)

    # Lane-misaligned shape with soft (non-binary) targets: exercises the sentinel
    # alignment pad and the exact general-target path.
    shape_odd = (3, 5, 17, 19)
    x2 = jax.random.normal(k3, shape_odd, dtype=jnp.float32)
    t2 = jax.random.uniform(k4, shape_odd)
    out2 = jax.block_until_ready(focal_loss(x2, t2))
    ref2 = focal_loss_ref(x2, t2)
    assert jnp.allclose(out2, ref2, rtol=1e-5, atol=1e-6), (out2, ref2)

    # Larger shape (20000 rows): exercises 8192-row DMA blocks, the 2-way TensorCore
    # split, the clamped/masked odd-block tail, and the binary-target EUP shortcut.
    shape_big = (4, 25, 200, 128)
    x3 = jax.random.normal(k5, shape_big, dtype=jnp.float32) * 2.0
    t3 = (jax.random.uniform(k6, shape_big) > 0.5).astype(jnp.float32)
    out3 = jax.block_until_ready(focal_loss(x3, t3, binary_targets=True))
    ref3 = focal_loss_ref(x3, t3)
    assert jnp.allclose(out3, ref3, rtol=1e-5, atol=1e-6), (out3, ref3)

    print("KERNEL_OK")
</pallas_src>

<mosaic_0001>
module attributes {stable_mosaic.version = 11 : i64} {
  func.func @_focal_loss_kernel(%arg0: i32, %arg1: i32, %arg2: memref<16x128xf32, #tpu.memory_space<vmem>>, %arg3: memref<16x128xf32, #tpu.memory_space<vmem>>, %arg4: memref<1x1xf32, #tpu.memory_space<smem>>, %arg5: memref<8x128xf32, #tpu.memory_space<vmem>>) attributes {dimension_semantics = [#tpu.dimension_semantics<parallel>, #tpu.dimension_semantics<arbitrary>], iteration_bounds = array<i64: 1, 1>, scalar_prefetch = 0 : i64, scratch_operands = 1 : i64, tpu.core_type = #tpu.core_type<tc>, window_params = [{transform_indices = @transform_0, window_bounds = array<i64: 16, 128>}, {transform_indices = @transform_1, window_bounds = array<i64: 16, 128>}, {transform_indices = @transform_2, window_bounds = array<i64: 1, 1>}]} {
    %c0_i32 = arith.constant 0 : i32
    %0 = arith.cmpi eq, %arg1, %c0_i32 : i32
    %1 = arith.extui %0 : i1 to i32
    %c0_i32_0 = arith.constant 0 : i32
    %2 = arith.cmpi ne, %1, %c0_i32_0 : i32
    scf.if %2 {
      %cst_14 = arith.constant 0.000000e+00 : f32
      %30 = vector.broadcast %cst_14 : f32 to vector<8x128xf32>
      %c0_15 = arith.constant 0 : index
      %c0_16 = arith.constant 0 : index
      %31 = vector.load %arg5[%c0_15, %c0_16] : memref<8x128xf32, #tpu.memory_space<vmem>>, vector<8x128xf32>
      tpu.vector_store %arg5[%c0_15, %c0_16], %30 {strides = array<i32>} : memref<8x128xf32, #tpu.memory_space<vmem>>, vector<8x128xf32>,
    } else {
    }
    %c0 = arith.constant 0 : index
    %c0_1 = arith.constant 0 : index
    %3 = vector.load %arg2[%c0, %c0_1] : memref<16x128xf32, #tpu.memory_space<vmem>>, vector<16x128xf32>
    %c0_2 = arith.constant 0 : index
    %c0_3 = arith.constant 0 : index
    %4 = vector.load %arg3[%c0_2, %c0_3] : memref<16x128xf32, #tpu.memory_space<vmem>>, vector<16x128xf32>
    %5 = math.absf %3 : vector<16x128xf32>
    %cst = arith.constant 0.000000e+00 : f32
    %6 = vector.broadcast %cst : f32 to vector<16x128xf32>
    %7 = arith.subf %6, %5 : vector<16x128xf32>
    %8 = math.exp %7 : vector<16x128xf32>
    %cst_4 = arith.constant 0.000000e+00 : f32
    %9 = vector.broadcast %cst_4 : f32 to vector<16x128xf32>
    %10 = arith.maximumf %3, %9 : vector<16x128xf32>
    %11 = arith.mulf %3, %4 : vector<16x128xf32>
    %12 = arith.subf %10, %11 : vector<16x128xf32>
    %13 = math.log1p %8 : vector<16x128xf32>
    %14 = arith.addf %12, %13 : vector<16x128xf32>
    %cst_5 = arith.constant 0.000000e+00 : f32
    %15 = vector.broadcast %cst_5 : f32 to vector<16x128xf32>
    %16 = arith.subf %15, %14 : vector<16x128xf32>
    %17 = math.exp %16 : vector<16x128xf32>
    %cst_6 = arith.constant 1.000000e+00 : f32
    %18 = vector.broadcast %cst_6 : f32 to vector<16x128xf32>
    %19 = arith.subf %18, %17 : vector<16x128xf32>
    %20 = arith.mulf %19, %19 : vector<16x128xf32>
    %21 = arith.mulf %20, %14 : vector<16x128xf32>
    %c0_7 = arith.constant 0 : index
    %c0_8 = arith.constant 0 : index
    %22 = vector.load %arg5[%c0_7, %c0_8] : memref<8x128xf32, #tpu.memory_space<vmem>>, vector<8x128xf32>
    %23 = vector.shape_cast %21 : vector<16x128xf32> to vector<2x8x128xf32>
    %cst_9 = arith.constant dense<0.000000e+00> : vector<8x128xf32>
    %24 = vector.multi_reduction <add>, %23, %cst_9 [0] : vector<2x8x128xf32> to vector<8x128xf32>
    %25 = arith.addf %22, %24 : vector<8x128xf32>
    %c0_10 = arith.constant 0 : index
    %c0_11 = arith.constant 0 : index
    %26 = vector.load %arg5[%c0_10, %c0_11] : memref<8x128xf32, #tpu.memory_space<vmem>>, vector<8x128xf32>
    tpu.vector_store %arg5[%c0_10, %c0_11], %25 {strides = array<i32>} : memref<8x128xf32, #tpu.memory_space<vmem>>, vector<8x128xf32>,
    %c0_i32_12 = arith.constant 0 : i32
    %27 = arith.cmpi eq, %arg1, %c0_i32_12 : i32
    %28 = arith.extui %27 : i1 to i32
    %c0_i32_13 = arith.constant 0 : i32
    %29 = arith.cmpi ne, %28, %c0_i32_13 : i32
    scf.if %29 {
      %c0_14 = arith.constant 0 : index
      %c0_15 = arith.constant 0 : index
      %30 = vector.load %arg5[%c0_14, %c0_15] : memref<8x128xf32, #tpu.memory_space<vmem>>, vector<8x128xf32>
      %31 = vector.shape_cast %30 : vector<8x128xf32> to vector<1x8x128xf32>
      %cst_16 = arith.constant dense<0.000000e+00> : vector<1xf32>
      %32 = vector.multi_reduction <add>, %31, %cst_16 [1, 2] : vector<1x8x128xf32> to vector<1xf32>
      %33 = vector.shape_cast %32 : vector<1xf32> to vector<1x1x1xf32>
      %34 = vector.extract %33[0, 0, 0] : f32 from vector<1x1x1xf32>
      %c0_17 = arith.constant 0 : index
      %c0_18 = arith.constant 0 : index
      %35 = memref.load %arg4[%c0_17, %c0_18] : memref<1x1xf32, #tpu.memory_space<smem>>
      memref.store %34, %arg4[%c0_17, %c0_18] : memref<1x1xf32, #tpu.memory_space<smem>>
    } else {
    }
    return
  }
  func.func @transform_0(%arg0: i32, %arg1: i32) -> (i32, i32) {
    %c1_i32 = arith.constant 1 : i32
    %0 = arith.muli %arg0, %c1_i32 : i32
    %1 = arith.addi %0, %arg1 : i32
    %c0_i32 = arith.constant 0 : i32
    %c0_i32_0 = arith.constant 0 : i32
    return %1, %c0_i32 : i32, i32
  }
  func.func @transform_1(%arg0: i32, %arg1: i32) -> (i32, i32) {
    %c1_i32 = arith.constant 1 : i32
    %0 = arith.muli %arg0, %c1_i32 : i32
    %1 = arith.addi %0, %arg1 : i32
    %c0_i32 = arith.constant 0 : i32
    %c0_i32_0 = arith.constant 0 : i32
    return %1, %c0_i32 : i32, i32
  }
  func.func @transform_2(%arg0: i32, %arg1: i32) -> (i32, i32) {
    %c0_i32 = arith.constant 0 : i32
    %c0_i32_0 = arith.constant 0 : i32
    return %arg0, %c0_i32 : i32, i32
  }
}

</mosaic_0001>

<bundles_post_ra>
// kernel: tpu_custom_call.1
= control target key start
LH: loop header
LB: loop body
LE: loop exit
PB: predicated region body
PF: predicated region fallthrough
CT: control target
= control target key end

     0   :  { %7 = vsyncpa [#allocation4], 0  ;;  %s276_s0 = inlined_call_operand.hbm [shape: f32[16,128], index: 0, kind: input, shape index: {}]   ;;  %s277_s1 = inlined_call_operand.hbm [shape: f32[16,128], index: 1, kind: input, shape index: {}]   ;;  %s278_s2 = inlined_call_operand.hbm [shape: f32[1,1], index: 2, kind: output, shape index: {}]  }
   0x1   :  { %8 = vsyncpa [#allocation7], 0 }
   0x2   :  { %9 = vsyncpa [#allocation5], 0  ;;  %s220_s9 = smov [#allocation3]   ;;  %s160_s13 = scalar_lea.hbm %s276_s0, 256 }
   0x3   :  { %s19_s10 = sshll.u32 %s220_s9, 4  ;;  %p161_p0 = scmp.ne.s32.totalorder %s276_s0, %s160_s13  ;;  %s20_s10 = int_to_ptr.vmem [resolvable:$true] %s19_s10 }
   0x4   :  { %p164_p1 = scmp.lt.u32.totalorder %s160_s13, %s276_s0 }
   0x6   :  { %p166_p2 = pnand %p164_p1, %p161_p0 }
   0x8   :  { %169 = shalt.err (!%p166_p2)
}
   0x9   :  { %s170_s18 = scalar_lea.vmem %s20_s10, 256  ;;  %p175_p4 = scmp.lt.s32.totalorder %s20_s10, %s20_s10 }
   0xa   :  { %p171_p3 = scmp.ne.s32.totalorder %s20_s10, %s170_s18  ;;  %p176_p5 = scmp.lt.s32.totalorder %s170_s18, %s170_s18 }
   0xc   :  { %p177_p6 = por %p176_p5, %p175_p4 }
   0xe   :  { %p178_p7 = pnand %p177_p6, %p171_p3 }
  0x10   :  { %181 = shalt.err (!%p178_p7)
}
  0x11   :  { %s221_s19 = smov 128   ;;  %s222_s20 = smov 8  }
  0x12   :  { %25 = dma.hbm_to_vmem [thread:$0]  %s276_s0, 256, %s20_s10, [#allocation4], %s221_s19, %s221_s19, %s222_s20  }
  0x13   :  { %s223_s23 = smov [#allocation6]   ;;  %s182_s27 = scalar_lea.hbm %s277_s1, 256 }
  0x14   :  { %s35_s24 = sshll.u32 %s223_s23, 4  ;;  %p183_p8 = scmp.ne.s32.totalorder %s277_s1, %s182_s27  ;;  %s36_s24 = int_to_ptr.vmem [resolvable:$true] %s35_s24 }
  0x15   :  { %p186_p9 = scmp.lt.u32.totalorder %s182_s27, %s277_s1 }
  0x17   :  { %p188_p10 = pnand %p186_p9, %p183_p8 }
  0x19   :  { %191 = shalt.err (!%p188_p10)
}
  0x1a   :  { %s192_s4 = scalar_lea.vmem %s36_s24, 256  ;;  %p197_p12 = scmp.lt.s32.totalorder %s36_s24, %s36_s24 }
  0x1b   :  { %p193_p11 = scmp.ne.s32.totalorder %s36_s24, %s192_s4  ;;  %p198_p13 = scmp.lt.s32.totalorder %s192_s4, %s192_s4 }
  0x1d   :  { %p199_p0 = por %p198_p13, %p197_p12 }
  0x1f   :  { %p200_p1 = pnand %p199_p0, %p193_p11 }
  0x21   :  { %203 = shalt.err (!%p200_p1)
}
  0x22   :  { %41 = dma.hbm_to_vmem [thread:$0]  %s277_s1, 256, %s36_s24, [#allocation7], %s221_s19, %s221_s19, %s222_s20  }
  0x23   :  { %214 = dma.done.wait [#allocation4], 256  }
  0x24   :  { %215 = vsyncadd [#allocation4], 4294967040 }
  0x25   :  { %216 = dma.done.wait [#allocation7], 256  }
  0x26   :  { %217 = vsyncadd [#allocation7], 4294967040  ;;  %v57_v0 = vld [vmem:[#allocation3] sm:$0xff]  ;;  %v58_v1 = vld [vmem:[#allocation3 + $0x8] sm:$0xff]  ;;  %s204_s8 = scalar_lea.hbm %s278_s2, 16 }
  0x27   :  { %v61_v2 = vand.u32 2147483647, %v57_v0  ;;  %v62_v3 = vand.u32 2147483647, %v58_v1  ;;  %v59_v14 = vld [vmem:[#allocation6] sm:$0xff]  ;;  %v60_v15 = vld [vmem:[#allocation6 + $0x8] sm:$0xff]  ;;  %p205_p2 = scmp.ne.s32.totalorder %s278_s2, %s204_s8  ;;  %p208_p3 = scmp.lt.u32.totalorder %s204_s8, %s278_s2 }
  0x28   :  { %v69_v17 = vmax.f32 %v57_v0, 0.0  ;;  %v71_v18 = vmul.f32 %v59_v14, %v57_v0  ;;  %v70_v21 = vmax.f32 %v58_v1, 0.0  ;;  %v72_v22 = vmul.f32 %v60_v15, %v58_v1 }
  0x29   :  { %v63_v4 = vsub.f32 0.0, %v61_v2  ;;  %v64_v5 = vsub.f32 0.0, %v62_v3  ;;  %p210_p4 = pnand %p208_p3, %p205_p2 }
  0x2a   :  { %v73_v26 = vsub.f32 %v69_v17, %v71_v18  ;;  %v74_v29 = vsub.f32 %v70_v21, %v72_v22 }
  0x2b   :  { %v65_v6 = vmul.f32 1.442695, %v63_v4  ;;  %v67_v7 = vmul.f32 1.442695, %v64_v5 }
  0x2d   :  { %148 = vpow2.f32 %v65_v6 }
  0x2e   :  { %150 = vpow2.f32 %v67_v7 }
  0x37   :  { %v149_v8 = vpop.eup %148 }
  0x38   :  { %v151_v9 = vpop.eup %150  ;;  %v75_v10 = vadd.f32 1.0, %v149_v8  ;;  %v78_v12 = vmul.f32 -0.5, %v149_v8  ;;  %v81_v19 = vand.u32 2147483647, %v149_v8 }
  0x39   :  { %v84_v11 = vadd.f32 1.0, %v151_v9  ;;  %v87_v13 = vmul.f32 -0.5, %v151_v9  ;;  %v90_v23 = vand.u32 2147483647, %v151_v9 }
  0x3a   :  { %152 = vlog2.f32 %v75_v10  ;;  %v79_v16 = vadd.f32 1.0, %v78_v12  ;;  %vm82_vm0 = vcmp.lt.f32.partialorder %v81_v19, 0.0004427343 }
  0x3b   :  { %154 = vlog2.f32 %v84_v11  ;;  %v88_v20 = vadd.f32 1.0, %v87_v13  ;;  %vm91_vm1 = vcmp.lt.f32.partialorder %v90_v23, 0.0004427343 }
  0x3c   :  { %v80_v24 = vmul.f32 %v149_v8, %v79_v16 }
  0x3d   :  { %v89_v27 = vmul.f32 %v151_v9, %v88_v20 }
  0x44   :  { %v153_v25 = vpop.eup %152 }
  0x45   :  { %v155_v28 = vpop.eup %154  ;;  %v77_v30 = vmul.f32 0.6931472, %v153_v25 }
  0x46   :  { %v86_v31 = vmul.f32 0.6931472, %v155_v28 }
  0x47   :  { %v83_v32 = vsel %vm82_vm0, %v80_v24, %v77_v30 }
  0x48   :  { %v92_v33 = vsel %vm91_vm1, %v89_v27, %v86_v31  ;;  %v93_v34 = vadd.f32 %v83_v32, %v73_v26 }
  0x49   :  { %v94_v35 = vadd.f32 %v92_v33, %v74_v29 }
  0x4a   :  { %v95_v36 = vsub.f32 0.0, %v93_v34 }
  0x4b   :  { %v96_v37 = vsub.f32 0.0, %v94_v35 }
  0x4c   :  { %v97_v38 = vmul.f32 1.442695, %v95_v36 }
  0x4d   :  { %v99_v39 = vmul.f32 1.442695, %v96_v37 }
  0x4e   :  { %156 = vpow2.f32 %v97_v38 }
  0x4f   :  { %158 = vpow2.f32 %v99_v39 }
  0x58   :  { %v157_v40 = vpop.eup %156 }
  0x59   :  { %v159_v41 = vpop.eup %158  ;;  %v101_v42 = vsub.f32 1.0, %v157_v40 }
  0x5a   :  { %v102_v43 = vsub.f32 1.0, %v159_v41 }
  0x5b   :  { %v103_v44 = vmul.f32 %v101_v42, %v101_v42 }
  0x5c   :  { %v104_v45 = vmul.f32 %v102_v43, %v102_v43 }
  0x5d   :  { %v105_v46 = vmul.f32 %v103_v44, %v93_v34 }
  0x5e   :  { %v106_v47 = vmul.f32 %v104_v45, %v94_v35 }
  0x60   :  { %v108_v48 = vadd.f32 %v106_v47, %v105_v46 }
  0x62   :  { %115 = vadd.xlane.f32.xlu0 %v108_v48 }
  0xef   :  { %v116_v49 = vpop.xlane.xlu0 %115 }
  0xf0   :  { %v117_v50 = vrot.slane %v116_v49, 4 }
  0xf2   :  { %v118_v51 = vadd.f32 %v117_v50, %v116_v49 }
  0xf4   :  { %v119_v52 = vrot.slane %v118_v51, 2 }
  0xf6   :  { %v120_v53 = vadd.f32 %v119_v52, %v118_v51 }
  0xf8   :  { %v121_v54 = vrot.slane %v120_v53, 1 }
  0xfa   :  { %v122_v55 = vadd.f32 %v121_v54, %v120_v53 }
  0xfc   :  { %141 = vpush %v122_v55 }
 0x12d   :  { %s142_s1 = spop %141 }
 0x12e   :  { %125 = sst [smem:[#allocation8]] %s142_s1 }
 0x12f   :  { %213 = shalt.err (!%p210_p4)
}
 0x130   :  { %s224_s13 = smov [#allocation8]  }
 0x131   :  { %133 = dma.smem_to_hbm %s224_s13, 16, %s278_s2, [#allocation5]  }
 0x132   :  { %218 = dma.done.wait [#allocation5], 16  }
 0x133   :  { %219 = vsyncadd [#allocation5], 4294967280 }
 0x134   :  { %137 = sfence }
 0x135   :  { %138 = vsyncpa [#allocation4], 1 }
 0x136   :  { %139 = vsyncpa [#allocation7], 1 }
 0x137   :  { %140 = vsyncpa [#allocation5], 1 }

</bundles_post_ra>
